<compile_context>
chip_gen: v6e
topology: v6e:2x2x1
jax: 0.10.0
libtpu: 0.0.40
codegen_flags: <defaults>
</compile_context>

<pallas_src>
import functools

import jax
import jax.numpy as jnp
from jax.experimental import pallas as pl
from jax.experimental.pallas import tpu as pltpu

_ROW_TILE = 16384               # original rows of x per grid step (pre-folding)
_VMEM_LIMIT = 32 * 1024 * 1024  # explicit so v5e (16 MiB default) fits the tile


def _round_up(v, m):
    return -(-v // m) * m


def _kernel_nodrop(x_ref, w_ref, b_ref, o_ref):
    y = jnp.dot(x_ref[...], w_ref[...], preferred_element_type=jnp.float32)
    o_ref[...] = jax.nn.sigmoid(y + b_ref[...]).astype(o_ref.dtype)


def _kernel_drop_hwprng(seed_ref, x_ref, w_ref, b_ref, o_ref, *,
                        keep_thresh, inv_keep):
    y = jnp.dot(x_ref[...], w_ref[...], preferred_element_type=jnp.float32)
    y = jax.nn.sigmoid(y + b_ref[...])
    # Reseed with (seed, tile index) so each row tile gets an independent,
    # lane-dense mask (no adjacent-integer-seed correlation).
    pltpu.prng_seed(seed_ref[0], pl.program_id(0))
    bits = pltpu.prng_random_bits(y.shape)
    if bits.dtype != jnp.uint32:
        bits = pltpu.bitcast(bits, jnp.uint32)
    keep = bits >= jnp.uint32(keep_thresh)        # P(keep) = 1 - p
    o_ref[...] = jnp.where(keep, y * inv_keep, 0.0).astype(o_ref.dtype)


def _kernel_drop_uniform(x_ref, u_ref, w_ref, b_ref, o_ref, *,
                         dropout_p, inv_keep):
    y = jnp.dot(x_ref[...], w_ref[...], preferred_element_type=jnp.float32)
    y = jax.nn.sigmoid(y + b_ref[...])
    keep = u_ref[...] >= jnp.float32(dropout_p)
    o_ref[...] = jnp.where(keep, y * inv_keep, 0.0).astype(o_ref.dtype)


def mirrna_embedding(x, weight, bias, *, dropout_p=0.0, training=False, seed=0):
    """Pallas TPU implementation of MirRNAEmbedding.forward.

    x:      [N, in_feats]          float32
    weight: [out_feats, in_feats]  float32 (PyTorch nn.Linear layout)
    bias:   [out_feats]            float32
    """
    N, K = x.shape
    M, K2 = weight.shape
    assert K == K2, "weight must be [out_feats, in_feats]"

    # ---- Lane density: fold `fold` rows per 128-wide lane group. -------------
    fold = (128 // K) if (0 < K <= 128 and 128 % K == 0) else 1
    Kf, Mf = fold * K, fold * M

    # One-time wrapper-side weight prep: transpose to [K, M], then block-diag
    # [Kf, Mf] so folded rows stay independent.  Bias tiled to [1, Mf].
    wt = weight.T.astype(jnp.float32)
    w_f = jnp.kron(jnp.eye(fold, dtype=jnp.float32), wt) if fold > 1 else wt
    b_f = jnp.tile(bias.astype(jnp.float32), fold).reshape(1, Mf)

    # Pad only to a multiple of `fold` (<= fold-1 rows), never to the row tile.
    Np = _round_up(N, fold)
    x_in = x if Np == N else jnp.pad(x, ((0, Np - N), (0, 0)))
    Nf = Np // fold
    x_f = x_in.reshape(Nf, Kf)                    # free contiguous reshape

    # ---- Row tiling (folded rows): big tile amortizes per-step overhead,
    # capped at ~half the rows (multiple of 8) so v7x uses both TensorCores;
    # boundary block is masked by Pallas (no tile-sized padding). --------------
    tn = min(max(8, _ROW_TILE // fold), _round_up(pl.cdiv(Nf, 2), 8))
    if tn >= Nf:
        tn = Nf                                   # single full-extent block
    grid = (pl.cdiv(Nf, tn),)

    out_shape = jax.ShapeDtypeStruct((Nf, Mf), x.dtype)
    cparams = pltpu.CompilerParams(dimension_semantics=("parallel",),
                                   vmem_limit_bytes=_VMEM_LIMIT)

    x_spec = pl.BlockSpec((tn, Kf), lambda i: (i, 0))
    w_spec = pl.BlockSpec((Kf, Mf), lambda i: (0, 0))   # resident, DMA'd once
    b_spec = pl.BlockSpec((1, Mf), lambda i: (0, 0))
    o_spec = pl.BlockSpec((tn, Mf), lambda i: (i, 0))

    use_dropout = bool(training) and float(dropout_p) > 0.0

    if not use_dropout:
        out = pl.pallas_call(
            _kernel_nodrop,
            out_shape=out_shape,
            grid_spec=pl.GridSpec(grid=grid,
                                  in_specs=[x_spec, w_spec, b_spec],
                                  out_specs=o_spec),
            compiler_params=cparams,
        )(x_f, w_f, b_f)
    elif jax.default_backend() == "tpu":
        keep_thresh = min(int(round(float(dropout_p) * (2 ** 32))), 2 ** 32 - 1)
        kernel = functools.partial(_kernel_drop_hwprng,
                                   keep_thresh=keep_thresh,
                                   inv_keep=float(1.0 / (1.0 - float(dropout_p))))
        seed_arr = jnp.asarray([seed], dtype=jnp.int32)
        out = pl.pallas_call(
            kernel,
            out_shape=out_shape,
            grid_spec=pltpu.PrefetchScalarGridSpec(
                num_scalar_prefetch=1,
                grid=grid,
                in_specs=[pl.BlockSpec((tn, Kf), lambda i, s: (i, 0)),
                          pl.BlockSpec((Kf, Mf), lambda i, s: (0, 0)),
                          pl.BlockSpec((1, Mf), lambda i, s: (0, 0))],
                out_specs=pl.BlockSpec((tn, Mf), lambda i, s: (i, 0)),
            ),
            compiler_params=cparams,
        )(seed_arr, x_f, w_f, b_f)
    else:
        # Non-TPU / interpret fallback: HW PRNG primitives have no lowering
        # there, so stream precomputed uniforms through the same tiling.
        u = jax.random.uniform(jax.random.PRNGKey(int(seed)), (Nf, Mf), jnp.float32)
        kernel = functools.partial(_kernel_drop_uniform,
                                   dropout_p=float(dropout_p),
                                   inv_keep=float(1.0 / (1.0 - float(dropout_p))))
        u_spec = pl.BlockSpec((tn, Mf), lambda i: (i, 0))
        out = pl.pallas_call(
            kernel,
            out_shape=out_shape,
            grid_spec=pl.GridSpec(grid=grid,
                                  in_specs=[x_spec, u_spec, w_spec, b_spec],
                                  out_specs=o_spec),
            compiler_params=cparams,
        )(x_f, u, w_f, b_f)

    out = out.reshape(Np, M)                      # free contiguous un-fold
    return out[:N] if Np != N else out


if __name__ == "__main__":
    # Shapes consistent with the module: in_feats=32, out_feats=64.
    IN_FEATS, OUT_FEATS = 32, 64
    DROPOUT = 0.25

    key = jax.random.PRNGKey(0)
    kx, kw, kb, kx2 = jax.random.split(key, 4)

    # PyTorch Linear default init: U(-1/sqrt(in), 1/sqrt(in))
    bound = 1.0 / (IN_FEATS ** 0.5)
    weight = jax.random.uniform(kw, (OUT_FEATS, IN_FEATS), jnp.float32, -bound, bound)
    bias = jax.random.uniform(kb, (OUT_FEATS,), jnp.float32, -bound, bound)

    # Small batch: N = 8 rows.
    N = 8
    x = jax.random.normal(kx, (N, IN_FEATS), jnp.float32)
    ref = jax.nn.sigmoid(x @ weight.T + bias)

    # Eval mode (dropout is identity): check against pure-JAX reference.
    out_eval = jax.block_until_ready(
        mirrna_embedding(x, weight, bias, dropout_p=DROPOUT, training=False))
    assert out_eval.shape == (N, OUT_FEATS)
    assert jnp.max(jnp.abs(out_eval - ref)) < 2e-5

    # Train mode: dropped entries exactly zero; kept entries scaled by 1/(1-p).
    out_train = jax.block_until_ready(
        mirrna_embedding(x, weight, bias, dropout_p=DROPOUT, training=True, seed=42))
    assert out_train.shape == (N, OUT_FEATS)
    assert jnp.all((out_train == 0.0)
                   | (jnp.abs(out_train - ref / (1.0 - DROPOUT)) < 2e-5))

    # Ragged row count: exercises the masked boundary block (grid = 2 tiles).
    N2 = 72
    x2 = jax.random.normal(kx2, (N2, IN_FEATS), jnp.float32)
    ref2 = jax.nn.sigmoid(x2 @ weight.T + bias)
    out2 = jax.block_until_ready(
        mirrna_embedding(x2, weight, bias, dropout_p=DROPOUT, training=False))
    assert out2.shape == (N2, OUT_FEATS)
    assert jnp.max(jnp.abs(out2 - ref2)) < 2e-5

    print("KERNEL_OK")
</pallas_src>

<mosaic_0001>
module attributes {stable_mosaic.version = 11 : i64} {
  func.func @_kernel_nodrop(%arg0: i32, %arg1: memref<2x128xf32, #tpu.memory_space<vmem>>, %arg2: memref<128x256xf32, #tpu.memory_space<vmem>>, %arg3: memref<1x256xf32, #tpu.memory_space<vmem>>, %arg4: memref<2x256xf32, #tpu.memory_space<vmem>>) attributes {dimension_semantics = [#tpu.dimension_semantics<parallel>], iteration_bounds = array<i64: 1>, scalar_prefetch = 0 : i64, scratch_operands = 0 : i64, tpu.core_type = #tpu.core_type<tc>, window_params = [{transform_indices = @transform_0, window_bounds = array<i64: 2, 128>}, {pipeline_mode = #tpu.pipeline_mode<synchronous>, transform_indices = @transform_1, window_bounds = array<i64: 128, 256>}, {pipeline_mode = #tpu.pipeline_mode<synchronous>, transform_indices = @transform_2, window_bounds = array<i64: 1, 256>}, {transform_indices = @transform_3, window_bounds = array<i64: 2, 256>}]} {
    %c0 = arith.constant 0 : index
    %c0_0 = arith.constant 0 : index
    %0 = vector.load %arg1[%c0, %c0_0] : memref<2x128xf32, #tpu.memory_space<vmem>>, vector<2x128xf32>
    %c0_1 = arith.constant 0 : index
    %c0_2 = arith.constant 0 : index
    %1 = vector.load %arg2[%c0_1, %c0_2] : memref<128x256xf32, #tpu.memory_space<vmem>>, vector<128x256xf32>
    %cst = arith.constant dense<0.000000e+00> : vector<2x256xf32>
    %2 = tpu.matmul %0, %1, %cst {dimension_numbers = #tpu.dot_dimension_numbers<[1], [0], [0], [1], [0, 0, 1, 1], [], []>} : vector<2x128xf32>, vector<128x256xf32>, vector<2x256xf32> -> vector<2x256xf32>
    %c0_3 = arith.constant 0 : index
    %c0_4 = arith.constant 0 : index
    %3 = vector.load %arg3[%c0_3, %c0_4] : memref<1x256xf32, #tpu.memory_space<vmem>>, vector<1x256xf32>
    %4 = vector.broadcast %3 : vector<1x256xf32> to vector<2x256xf32>
    %5 = arith.addf %2, %4 : vector<2x256xf32>
    %6 = arith.negf %5 : vector<2x256xf32>
    %7 = math.exp %6 : vector<2x256xf32>
    %cst_5 = arith.constant 1.000000e+00 : f32
    %8 = vector.broadcast %cst_5 : f32 to vector<2x256xf32>
    %9 = arith.addf %8, %7 : vector<2x256xf32>
    %10 = arith.divf %8, %9 : vector<2x256xf32>
    %c0_6 = arith.constant 0 : index
    %c0_7 = arith.constant 0 : index
    %11 = vector.load %arg4[%c0_6, %c0_7] : memref<2x256xf32, #tpu.memory_space<vmem>>, vector<2x256xf32>
    tpu.vector_store %arg4[%c0_6, %c0_7], %10 {strides = array<i32>} : memref<2x256xf32, #tpu.memory_space<vmem>>, vector<2x256xf32>,
    return
  }
  func.func @transform_0(%arg0: i32) -> (i32, i32) {
    %c0_i32 = arith.constant 0 : i32
    %c0_i32_0 = arith.constant 0 : i32
    return %arg0, %c0_i32 : i32, i32
  }
  func.func @transform_1(%arg0: i32) -> (i32, i32) {
    %c0_i32 = arith.constant 0 : i32
    %c0_i32_0 = arith.constant 0 : i32
    %c0_i32_1 = arith.constant 0 : i32
    return %c0_i32, %c0_i32_0 : i32, i32
  }
  func.func @transform_2(%arg0: i32) -> (i32, i32) {
    %c0_i32 = arith.constant 0 : i32
    %c0_i32_0 = arith.constant 0 : i32
    %c0_i32_1 = arith.constant 0 : i32
    return %c0_i32, %c0_i32_0 : i32, i32
  }
  func.func @transform_3(%arg0: i32) -> (i32, i32) {
    %c0_i32 = arith.constant 0 : i32
    %c0_i32_0 = arith.constant 0 : i32
    return %arg0, %c0_i32 : i32, i32
  }
}

</mosaic_0001>

<bundles_post_ra>
// kernel: tpu_custom_call.1
= control target key start
LH: loop header
LB: loop body
LE: loop exit
PB: predicated region body
PF: predicated region fallthrough
CT: control target
= control target key end

     0   :  { %8 = vsyncpa [#allocation3], 0  ;;  %s318_s0 = inlined_call_operand.hbm [shape: f32[2,128], index: 0, kind: input, shape index: {}]   ;;  %s319_s1 = inlined_call_operand.hbm [shape: f32[128,256], index: 1, kind: input, shape index: {}]   ;;  %s320_s2 = inlined_call_operand.vmem [shape: f32[1,256], index: 2, kind: input, shape index: {}]   ;;  %s321_s3 = inlined_call_operand.hbm [shape: f32[2,256], index: 3, kind: output, shape index: {}]  }
   0x1   :  { %9 = vsyncpa [#allocation6], 0 }
   0x2   :  { %10 = vsyncpa [#allocation4], 0  ;;  %s280_s12 = smov [#allocation2]   ;;  %s281_s14 = smov [#allocation5]  }
   0x3   :  { %s17_s13 = sshll.u32 %s280_s12, 4  ;;  %s26_s15 = sshll.u32 %s281_s14, 4  ;;  %s18_s13 = int_to_ptr.vmem [resolvable:$true] %s17_s13  ;;  %s27_s15 = int_to_ptr.vmem [resolvable:$true] %s26_s15 }
   0x4   :  { %s222_s16 = scalar_lea.vmem %s18_s13, 32  ;;  %p227_p1 = scmp.lt.s32.totalorder %s18_s13, %s18_s13 }
   0x5   :  { %p223_p0 = scmp.ne.s32.totalorder %s18_s13, %s222_s16  ;;  %p228_p2 = scmp.lt.s32.totalorder %s222_s16, %s222_s16 }
   0x7   :  { %p229_p3 = por %p228_p2, %p227_p1 }
   0x9   :  { %p230_p4 = pnand %p229_p3, %p223_p0 }
   0xb   :  { %233 = shalt.err (!%p230_p4)
}
   0xc   :  { %20 = dma.hbm_to_vmem [thread:$0]  %s318_s0, 32, %s18_s13, [#allocation3]  }
   0xd   :  { %s242_s19 = scalar_lea.vmem %s27_s15, 4096  ;;  %p247_p6 = scmp.lt.s32.totalorder %s27_s15, %s27_s15 }
   0xe   :  { %p243_p5 = scmp.ne.s32.totalorder %s27_s15, %s242_s19  ;;  %p248_p7 = scmp.lt.s32.totalorder %s242_s19, %s242_s19 }
  0x10   :  { %p249_p8 = por %p248_p7, %p247_p6 }
  0x12   :  { %p250_p9 = pnand %p249_p8, %p243_p5 }
  0x14   :  { %253 = shalt.err (!%p250_p9)
}
  0x15   :  { %s282_s20 = smov 256   ;;  %s283_s21 = smov 16  }
  0x16   :  { %32 = dma.hbm_to_vmem [thread:$0]  %s319_s1, 4096, %s27_s15, [#allocation6], %s282_s20, %s282_s20, %s283_s21  }
  0x17   :  { %274 = dma.done.wait [#allocation3], 32  }
  0x18   :  { %275 = vsyncadd [#allocation3], 4294967264 }
  0x19   :  { %276 = dma.done.wait [#allocation6], 4096  }
  0x1a   :  { %277 = vsyncadd [#allocation6], 4294963200  ;;  %v284_v0 = vmov 0.0   ;;  %v73_v1 = vld [vmem:[#allocation5 + $0xf8] sm:$0xff]  ;;  %v72_v2 = vld [vmem:[#allocation5 + $0xf0] sm:$0xff]  ;;  %v76_v34 = vlaneseq  ;;  %s285_s24 = smov [#allocation7]  }
  0x1b   :  { %150 = vmatprep.mubr.f32.mxu0 %v284_v0  ;;  %v71_v3 = vld [vmem:[#allocation5 + $0xe8] sm:$0xff]  ;;  %86 = vmatprep.subr.mxu0 %v73_v1  ;;  %v70_v4 = vld [vmem:[#allocation5 + $0xe0] sm:$0xff]  ;;  %v69_v5 = vld [vmem:[#allocation5 + $0xd8] sm:$0xff]  ;;  %s187_s25 = sshll.u32 %s285_s24, 4  ;;  %s188_s25 = int_to_ptr.vmem [resolvable:$true] %s187_s25 }
  0x1c   :  { %87 = vmatpush1.msra.mxu0 %v72_v2  ;;  %v68_v6 = vld [vmem:[#allocation5 + $0xd0] sm:$0xff]  ;;  %v67_v7 = vld [vmem:[#allocation5 + $0xc8] sm:$0xff]  ;;  %v66_v8 = vld [vmem:[#allocation5 + $0xc0] sm:$0xff]  ;;  %v77_v35 = vshrl.u32 %v76_v34, 7  ;;  %p259_p11 = scmp.lt.s32.totalorder %s188_s25, %s188_s25 }
  0x1d   :  { %88 = vmatprep.subr.mxu0 %v71_v3  ;;  %v65_v9 = vld [vmem:[#allocation5 + $0xb8] sm:$0xff]  ;;  %v64_v10 = vld [vmem:[#allocation5 + $0xb0] sm:$0xff]  ;;  %v63_v11 = vld [vmem:[#allocation5 + $0xa8] sm:$0xff] }
  0x1e   :  { %89 = vmatpush1.msra.mxu0 %v70_v4  ;;  %v62_v12 = vld [vmem:[#allocation5 + $0xa0] sm:$0xff]  ;;  %v61_v13 = vld [vmem:[#allocation5 + $0x98] sm:$0xff]  ;;  %v60_v14 = vld [vmem:[#allocation5 + $0x90] sm:$0xff]  ;;  %v78_v36 = vsub.s32 0, %v77_v35  ;;  %v82_v38 = vsub.s32 1, %v77_v35 }
  0x1f   :  { %90 = vmatprep.subr.mxu0 %v69_v5  ;;  %v59_v15 = vld [vmem:[#allocation5 + $0x88] sm:$0xff]  ;;  %v58_v16 = vld [vmem:[#allocation5 + $0x80] sm:$0xff]  ;;  %v57_v17 = vld [vmem:[#allocation5 + $0x78] sm:$0xff] }
  0x20   :  { %91 = vmatpush1.msra.mxu0 %v68_v6  ;;  %v56_v18 = vld [vmem:[#allocation5 + $0x70] sm:$0xff]  ;;  %v55_v19 = vld [vmem:[#allocation5 + $0x68] sm:$0xff]  ;;  %v54_v20 = vld [vmem:[#allocation5 + $0x60] sm:$0xff] }
  0x21   :  { %92 = vmatprep.subr.mxu0 %v67_v7  ;;  %v53_v21 = vld [vmem:[#allocation5 + $0x58] sm:$0xff]  ;;  %v52_v22 = vld [vmem:[#allocation5 + $0x50] sm:$0xff]  ;;  %v51_v23 = vld [vmem:[#allocation5 + $0x48] sm:$0xff] }
  0x22   :  { %93 = vmatpush1.msra.mxu0 %v66_v8  ;;  %v50_v24 = vld [vmem:[#allocation5 + $0x40] sm:$0xff]  ;;  %v49_v25 = vld [vmem:[#allocation5 + $0x38] sm:$0xff]  ;;  %v48_v26 = vld [vmem:[#allocation5 + $0x30] sm:$0xff] }
  0x23   :  { %94 = vmatprep.subr.mxu0 %v65_v9  ;;  %v47_v27 = vld [vmem:[#allocation5 + $0x28] sm:$0xff]  ;;  %v46_v28 = vld [vmem:[#allocation5 + $0x20] sm:$0xff]  ;;  %v45_v29 = vld [vmem:[#allocation5 + $0x18] sm:$0xff] }
  0x24   :  { %95 = vmatpush1.msra.mxu0 %v64_v10  ;;  %v44_v30 = vld [vmem:[#allocation5 + $0x10] sm:$0xff]  ;;  %v43_v31 = vld [vmem:[#allocation5 + $0x8] sm:$0xff]  ;;  %v42_v32 = vld [vmem:[#allocation5] sm:$0xff] }
  0x25   :  { %96 = vmatprep.subr.mxu0 %v63_v11  ;;  %v41_v33 = vld [vmem:[#allocation2] sm:$0x3] }
  0x26   :  { %97 = vmatpush1.msra.mxu0 %v62_v12  ;;  %v74_v37 = vld [vmem:[%s320_s2] sm:$0x3]  ;;  %s254_s2 = scalar_lea.vmem %s188_s25, 64 }
  0x27   :  { %98 = vmatprep.subr.mxu0 %v61_v13  ;;  %v79_v39 = vrot.slane %v74_v37, %v78_v36  ;;  %v83_v40 = vrot.slane %v74_v37, %v82_v38  ;;  %p255_p10 = scmp.ne.s32.totalorder %s188_s25, %s254_s2  ;;  %p260_p12 = scmp.lt.s32.totalorder %s254_s2, %s254_s2 }
  0x28   :  { %99 = vmatpush1.msra.mxu0 %v60_v14 }
  0x29   :  { %100 = vmatprep.subr.mxu0 %v59_v15  ;;  %p261_p13 = por %p260_p12, %p259_p11 }
  0x2a   :  { %101 = vmatpush1.msra.mxu0 %v58_v16 }
  0x2b   :  { %102 = vmatprep.subr.mxu0 %v57_v17  ;;  %p262_p0 = pnand %p261_p13, %p255_p10 }
  0x2c   :  { %103 = vmatpush1.msra.mxu0 %v56_v18 }
  0x2d   :  { %104 = vmatprep.subr.mxu0 %v55_v19 }
  0x2e   :  { %105 = vmatpush1.msra.mxu0 %v54_v20 }
  0x2f   :  { %106 = vmatprep.subr.mxu0 %v53_v21 }
  0x30   :  { %107 = vmatpush1.msra.mxu0 %v52_v22 }
  0x31   :  { %108 = vmatprep.subr.mxu0 %v51_v23 }
  0x32   :  { %109 = vmatpush1.msra.mxu0 %v50_v24 }
  0x33   :  { %110 = vmatprep.subr.mxu0 %v49_v25 }
  0x34   :  { %111 = vmatpush1.msra.mxu0 %v48_v26 }
  0x35   :  { %112 = vmatprep.subr.mxu0 %v47_v27 }
  0x36   :  { %113 = vmatpush1.msra.mxu0 %v46_v28 }
  0x37   :  { %114 = vmatprep.subr.mxu0 %v45_v29 }
  0x38   :  { %115 = vmatpush1.msra.mxu0 %v44_v30 }
  0x39   :  { %116 = vmatprep.subr.mxu0 %v43_v31 }
  0x3a   :  { %117 = vmatpush1.msra.mxu0 %v42_v32 }
  0x3b   :  { %151 = vmatmul.mubr.f32.vlgmr.msra.gmra.mxu0 %v41_v33 }
  0xfb   :  { %v152_v41 = vpop.f32.mrf.mxu0 }
  0xfc   :  { %v153_v42 = vadd.f32 %v152_v41, %v79_v39 }
  0xfd   :  { %v154_v43 = vpop.f32.mrf.mxu0 }
  0xfe   :  { %v197_v44 = vmul.f32 -1.442695, %v153_v42  ;;  %v155_v45 = vadd.f32 %v154_v43, %v83_v40 }
 0x100   :  { %206 = vpow2.f32 %v197_v44  ;;  %v198_v46 = vmul.f32 -1.442695, %v155_v45 }
 0x102   :  { %208 = vpow2.f32 %v198_v46 }
 0x10d   :  { %v207_v47 = vpop.eup %206 }
 0x10e   :  { %v163_v48 = vadd.f32 1.0, %v207_v47 }
 0x10f   :  { %v209_v49 = vpop.eup %208 }
 0x110   :  { %v164_v50 = vadd.f32 1.0, %v209_v49  ;;  %210 = vrcp.f32 %v163_v48 }
 0x112   :  { %212 = vrcp.f32 %v164_v50 }
 0x11d   :  { %v211_v51 = vpop.eup %210 }
 0x11f   :  { %v213_v52 = vpop.eup %212 }
 0x120   :  { %v171_v53 = vcombine.low %v211_v51, %v213_v52 }
 0x122   :  { %199 = vst.sshfl [vmem:[#allocation7] sm:$0x33 pattern:$0x76325410] %v171_v53 }
 0x123   :  { %265 = shalt.err (!%p262_p0)
}
 0x124   :  { %190 = dma.vmem_to_hbm [thread:$0]  %s188_s25, 64, %s321_s3, [#allocation4]  }
 0x125   :  { %278 = dma.done.wait [#allocation4], 64  }
 0x126   :  { %279 = vsyncadd [#allocation4], 4294967232 }
 0x127   :  { %194 = vsyncpa [#allocation3], 1 }
 0x128   :  { %195 = vsyncpa [#allocation6], 1 }
 0x129   :  { %196 = vsyncpa [#allocation4], 1 }

</bundles_post_ra>
